<compile_context>
chip_gen: v7x
topology: tpu7x:2x2x1
jax: 0.10.0
libtpu: 0.0.40
codegen_flags: <defaults>
</compile_context>

<pallas_src>
import functools

import jax
import jax.numpy as jnp
from jax.experimental import pallas as pl
from jax.experimental.pallas import tpu as pltpu

MIN_ACTION = -20.0
MAX_ACTION = 20.0
N_PAD = 128          # lane-dense head width (mean cols | log_std col | zero pad)


def _policy_kernel(obs_ref, w1_ref, b1_ref, w2_ref, b2_ref, wh_ref, bh_ref,
                   lo_ref, hi_ref, out_ref):
    """One batch tile of the full forward pass (weights resident in VMEM)."""
    x = obs_ref[...]                                                   # [tb, obs_dim] f32

    # base_net: Linear -> ReLU -> Linear -> ReLU (f32 matmuls, f32 accumulation).
    h1 = jnp.dot(x, w1_ref[...], preferred_element_type=jnp.float32) + b1_ref[...]
    h1 = jnp.maximum(h1, 0.0)
    h2 = jnp.dot(h1, w2_ref[...], preferred_element_type=jnp.float32) + b2_ref[...]
    h2 = jnp.maximum(h2, 0.0)

    # Fused, 128-lane padded heads: [mean | log_std | zeros] in a single matmul.
    heads = jnp.dot(h2, wh_ref[...], preferred_element_type=jnp.float32) + bh_ref[...]

    # Per-column clip bounds: ±20 on mean columns (double Hardtanh with identical
    # bounds == one clip), ±inf elsewhere (log_std + padding pass through).
    out_ref[...] = jnp.minimum(jnp.maximum(heads, lo_ref[...]), hi_ref[...])


def _round_up(x, m):
    return (x + m - 1) // m * m


@functools.partial(jax.jit, static_argnames=("action_dim",))
def gaussian_policy_forward(obs, params, action_dim=2):
    """Batch-tiled Pallas call; returns (mean [B, A], log_std [B, 1]) in f32."""
    B, obs_dim = obs.shape
    w1, b1, w2, b2, wm, bm, ws, bs = params
    hidden = w2.shape[1]
    n_out = action_dim + 1

    # Fuse the two heads and zero-pad to 128 lanes for a lane-dense output store.
    w_heads = jnp.zeros((hidden, N_PAD), jnp.float32)
    w_heads = w_heads.at[:, :action_dim].set(wm.astype(jnp.float32))
    w_heads = w_heads.at[:, action_dim:n_out].set(ws.astype(jnp.float32))
    b_heads = jnp.zeros((1, N_PAD), jnp.float32)
    b_heads = b_heads.at[:, :action_dim].set(bm.astype(jnp.float32))
    b_heads = b_heads.at[:, action_dim:n_out].set(bs.astype(jnp.float32))

    # Per-column clip bounds (mean cols clipped to ±20, everything else open).
    col = jnp.arange(N_PAD)
    lo = jnp.where(col < action_dim, MIN_ACTION, -jnp.inf).astype(jnp.float32)[None, :]
    hi = jnp.where(col < action_dim, MAX_ACTION, jnp.inf).astype(jnp.float32)[None, :]

    w1_f, w2_f = w1.astype(jnp.float32), w2.astype(jnp.float32)
    b1_f, b2_f = b1.astype(jnp.float32), b2.astype(jnp.float32)

    # Batch tile: big enough to amortize the ~0.35 us per-step overhead, capped
    # at 2048 (tiny vs. scoped VMEM on every generation), and sized to ceil(B/2)
    # so the grid has >= 2 steps -> both v7x TensorCores get work at mid B.
    half_b = -(-B // 2)
    tile_b = min(2048, max(8, _round_up(half_b, 8)))
    grid = (pl.cdiv(B, tile_b),)

    # Weights / biases / bounds: constant index_map -> VMEM-resident across steps.
    const = lambda shape: pl.BlockSpec(shape, lambda i: (0, 0))

    out = pl.pallas_call(
        _policy_kernel,
        grid=grid,
        in_specs=[
            pl.BlockSpec((tile_b, obs_dim), lambda i: (i, 0)),   # obs: tiled over batch
            const(w1_f.shape), const(b1_f.shape),
            const(w2_f.shape), const(b2_f.shape),
            const(w_heads.shape), const(b_heads.shape),
            const(lo.shape), const(hi.shape),
        ],
        out_specs=pl.BlockSpec((tile_b, N_PAD), lambda i: (i, 0)),
        out_shape=jax.ShapeDtypeStruct((B, N_PAD), jnp.float32),
        compiler_params=pltpu.CompilerParams(
            dimension_semantics=("parallel",),       # shard batch across TCs (v7x)
            vmem_limit_bytes=32 * 1024 * 1024,
        ),
    )(obs, w1_f, b1_f, w2_f, b2_f, w_heads, b_heads, lo, hi)

    mean = out[:, :action_dim]
    log_std = out[:, action_dim:n_out]
    return mean, log_std


def init_params(key, obs_dim, action_dim, h1=64, h2=64):
    """Deterministic synthetic weights (PyTorch-style uniform fan-in init)."""
    def linear(key, fan_in, fan_out):
        kw, kb = jax.random.split(key)
        bound = 1.0 / jnp.sqrt(fan_in)
        w = jax.random.uniform(kw, (fan_in, fan_out), jnp.float32, -bound, bound)
        b = jax.random.uniform(kb, (1, fan_out), jnp.float32, -bound, bound)
        return w, b

    k1, k2, k3, k4 = jax.random.split(key, 4)
    w1, b1 = linear(k1, obs_dim, h1)
    w2, b2 = linear(k2, h1, h2)
    wm, bm = linear(k3, h2, action_dim)
    ws, bs = linear(k4, h2, 1)
    return (w1, b1, w2, b2, wm, bm, ws, bs)


def _reference_forward(obs, params):
    """Pure-JAX f32 reference for correctness checking."""
    w1, b1, w2, b2, wm, bm, ws, bs = params
    h = jnp.maximum(obs @ w1 + b1, 0.0)
    h = jnp.maximum(h @ w2 + b2, 0.0)
    mean = jnp.clip(h @ wm + bm, MIN_ACTION, MAX_ACTION)
    log_std = h @ ws + bs
    return mean, log_std


if __name__ == "__main__":
    key = jax.random.PRNGKey(0)
    k_obs, k_params = jax.random.split(key)

    B, OBS_DIM, ACTION_DIM = 8, 16, 2
    obs = jax.random.normal(k_obs, (B, OBS_DIM), jnp.float32)
    params = init_params(k_params, OBS_DIM, ACTION_DIM)

    mean, log_std = gaussian_policy_forward(obs, params, action_dim=ACTION_DIM)
    jax.block_until_ready((mean, log_std))

    ref_mean, ref_log_std = _reference_forward(obs, params)
    assert mean.shape == (B, ACTION_DIM) and log_std.shape == (B, 1)
    # All-f32 path now -> tight tolerance vs. the pure-f32 reference.
    assert jnp.allclose(mean, ref_mean, atol=1e-4, rtol=1e-4)
    assert jnp.allclose(log_std, ref_log_std, atol=1e-4, rtol=1e-4)

    print("KERNEL_OK")
</pallas_src>

<mosaic_0001>
module attributes {stable_mosaic.version = 11 : i64} {
  func.func @_policy_kernel(%arg0: i32, %arg1: memref<8x16xf32, #tpu.memory_space<vmem>>, %arg2: memref<16x64xf32, #tpu.memory_space<vmem>>, %arg3: memref<1x64xf32, #tpu.memory_space<vmem>>, %arg4: memref<64x64xf32, #tpu.memory_space<vmem>>, %arg5: memref<1x64xf32, #tpu.memory_space<vmem>>, %arg6: memref<64x128xf32, #tpu.memory_space<vmem>>, %arg7: memref<1x128xf32, #tpu.memory_space<vmem>>, %arg8: memref<1x128xf32, #tpu.memory_space<vmem>>, %arg9: memref<1x128xf32, #tpu.memory_space<vmem>>, %arg10: memref<8x128xf32, #tpu.memory_space<vmem>>) attributes {dimension_semantics = [#tpu.dimension_semantics<parallel>], iteration_bounds = array<i64: 1>, scalar_prefetch = 0 : i64, scratch_operands = 0 : i64, tpu.core_type = #tpu.core_type<tc>, window_params = [{transform_indices = @transform_0, window_bounds = array<i64: 8, 16>}, {pipeline_mode = #tpu.pipeline_mode<synchronous>, transform_indices = @transform_1, window_bounds = array<i64: 16, 64>}, {pipeline_mode = #tpu.pipeline_mode<synchronous>, transform_indices = @transform_2, window_bounds = array<i64: 1, 64>}, {pipeline_mode = #tpu.pipeline_mode<synchronous>, transform_indices = @transform_3, window_bounds = array<i64: 64, 64>}, {pipeline_mode = #tpu.pipeline_mode<synchronous>, transform_indices = @transform_4, window_bounds = array<i64: 1, 64>}, {pipeline_mode = #tpu.pipeline_mode<synchronous>, transform_indices = @transform_5, window_bounds = array<i64: 64, 128>}, {pipeline_mode = #tpu.pipeline_mode<synchronous>, transform_indices = @transform_6, window_bounds = array<i64: 1, 128>}, {pipeline_mode = #tpu.pipeline_mode<synchronous>, transform_indices = @transform_7, window_bounds = array<i64: 1, 128>}, {pipeline_mode = #tpu.pipeline_mode<synchronous>, transform_indices = @transform_8, window_bounds = array<i64: 1, 128>}, {transform_indices = @transform_9, window_bounds = array<i64: 8, 128>}]} {
    %c0 = arith.constant 0 : index
    %c0_0 = arith.constant 0 : index
    %0 = vector.load %arg1[%c0, %c0_0] : memref<8x16xf32, #tpu.memory_space<vmem>>, vector<8x16xf32>
    %c0_1 = arith.constant 0 : index
    %c0_2 = arith.constant 0 : index
    %1 = vector.load %arg2[%c0_1, %c0_2] : memref<16x64xf32, #tpu.memory_space<vmem>>, vector<16x64xf32>
    %cst = arith.constant dense<0.000000e+00> : vector<8x64xf32>
    %2 = tpu.matmul %0, %1, %cst {dimension_numbers = #tpu.dot_dimension_numbers<[1], [0], [0], [1], [0, 0, 1, 1], [], []>} : vector<8x16xf32>, vector<16x64xf32>, vector<8x64xf32> -> vector<8x64xf32>
    %c0_3 = arith.constant 0 : index
    %c0_4 = arith.constant 0 : index
    %3 = vector.load %arg3[%c0_3, %c0_4] : memref<1x64xf32, #tpu.memory_space<vmem>>, vector<1x64xf32>
    %4 = vector.broadcast %3 : vector<1x64xf32> to vector<8x64xf32>
    %5 = arith.addf %2, %4 : vector<8x64xf32>
    %cst_5 = arith.constant 0.000000e+00 : f32
    %6 = vector.broadcast %cst_5 : f32 to vector<8x64xf32>
    %7 = arith.maximumf %5, %6 : vector<8x64xf32>
    %c0_6 = arith.constant 0 : index
    %c0_7 = arith.constant 0 : index
    %8 = vector.load %arg4[%c0_6, %c0_7] : memref<64x64xf32, #tpu.memory_space<vmem>>, vector<64x64xf32>
    %cst_8 = arith.constant dense<0.000000e+00> : vector<8x64xf32>
    %9 = tpu.matmul %7, %8, %cst_8 {dimension_numbers = #tpu.dot_dimension_numbers<[1], [0], [0], [1], [0, 0, 1, 1], [], []>} : vector<8x64xf32>, vector<64x64xf32>, vector<8x64xf32> -> vector<8x64xf32>
    %c0_9 = arith.constant 0 : index
    %c0_10 = arith.constant 0 : index
    %10 = vector.load %arg5[%c0_9, %c0_10] : memref<1x64xf32, #tpu.memory_space<vmem>>, vector<1x64xf32>
    %11 = vector.broadcast %10 : vector<1x64xf32> to vector<8x64xf32>
    %12 = arith.addf %9, %11 : vector<8x64xf32>
    %cst_11 = arith.constant 0.000000e+00 : f32
    %13 = vector.broadcast %cst_11 : f32 to vector<8x64xf32>
    %14 = arith.maximumf %12, %13 : vector<8x64xf32>
    %c0_12 = arith.constant 0 : index
    %c0_13 = arith.constant 0 : index
    %15 = vector.load %arg6[%c0_12, %c0_13] : memref<64x128xf32, #tpu.memory_space<vmem>>, vector<64x128xf32>
    %cst_14 = arith.constant dense<0.000000e+00> : vector<8x128xf32>
    %16 = tpu.matmul %14, %15, %cst_14 {dimension_numbers = #tpu.dot_dimension_numbers<[1], [0], [0], [1], [0, 0, 1, 1], [], []>} : vector<8x64xf32>, vector<64x128xf32>, vector<8x128xf32> -> vector<8x128xf32>
    %c0_15 = arith.constant 0 : index
    %c0_16 = arith.constant 0 : index
    %17 = vector.load %arg7[%c0_15, %c0_16] : memref<1x128xf32, #tpu.memory_space<vmem>>, vector<1x128xf32>
    %18 = vector.broadcast %17 : vector<1x128xf32> to vector<8x128xf32>
    %19 = arith.addf %16, %18 : vector<8x128xf32>
    %c0_17 = arith.constant 0 : index
    %c0_18 = arith.constant 0 : index
    %20 = vector.load %arg8[%c0_17, %c0_18] : memref<1x128xf32, #tpu.memory_space<vmem>>, vector<1x128xf32>
    %21 = vector.broadcast %20 : vector<1x128xf32> to vector<8x128xf32>
    %22 = arith.maximumf %19, %21 : vector<8x128xf32>
    %c0_19 = arith.constant 0 : index
    %c0_20 = arith.constant 0 : index
    %23 = vector.load %arg9[%c0_19, %c0_20] : memref<1x128xf32, #tpu.memory_space<vmem>>, vector<1x128xf32>
    %24 = vector.broadcast %23 : vector<1x128xf32> to vector<8x128xf32>
    %25 = arith.minimumf %22, %24 : vector<8x128xf32>
    %c0_21 = arith.constant 0 : index
    %c0_22 = arith.constant 0 : index
    %26 = vector.load %arg10[%c0_21, %c0_22] : memref<8x128xf32, #tpu.memory_space<vmem>>, vector<8x128xf32>
    tpu.vector_store %arg10[%c0_21, %c0_22], %25 {strides = array<i32>} : memref<8x128xf32, #tpu.memory_space<vmem>>, vector<8x128xf32>,
    return
  }
  func.func @transform_0(%arg0: i32) -> (i32, i32) {
    %c0_i32 = arith.constant 0 : i32
    %c0_i32_0 = arith.constant 0 : i32
    return %arg0, %c0_i32 : i32, i32
  }
  func.func @transform_1(%arg0: i32) -> (i32, i32) {
    %c0_i32 = arith.constant 0 : i32
    %c0_i32_0 = arith.constant 0 : i32
    %c0_i32_1 = arith.constant 0 : i32
    return %c0_i32, %c0_i32_0 : i32, i32
  }
  func.func @transform_2(%arg0: i32) -> (i32, i32) {
    %c0_i32 = arith.constant 0 : i32
    %c0_i32_0 = arith.constant 0 : i32
    %c0_i32_1 = arith.constant 0 : i32
    return %c0_i32, %c0_i32_0 : i32, i32
  }
  func.func @transform_3(%arg0: i32) -> (i32, i32) {
    %c0_i32 = arith.constant 0 : i32
    %c0_i32_0 = arith.constant 0 : i32
    %c0_i32_1 = arith.constant 0 : i32
    return %c0_i32, %c0_i32_0 : i32, i32
  }
  func.func @transform_4(%arg0: i32) -> (i32, i32) {
    %c0_i32 = arith.constant 0 : i32
    %c0_i32_0 = arith.constant 0 : i32
    %c0_i32_1 = arith.constant 0 : i32
    return %c0_i32, %c0_i32_0 : i32, i32
  }
  func.func @transform_5(%arg0: i32) -> (i32, i32) {
    %c0_i32 = arith.constant 0 : i32
    %c0_i32_0 = arith.constant 0 : i32
    %c0_i32_1 = arith.constant 0 : i32
    return %c0_i32, %c0_i32_0 : i32, i32
  }
  func.func @transform_6(%arg0: i32) -> (i32, i32) {
    %c0_i32 = arith.constant 0 : i32
    %c0_i32_0 = arith.constant 0 : i32
    %c0_i32_1 = arith.constant 0 : i32
    return %c0_i32, %c0_i32_0 : i32, i32
  }
  func.func @transform_7(%arg0: i32) -> (i32, i32) {
    %c0_i32 = arith.constant 0 : i32
    %c0_i32_0 = arith.constant 0 : i32
    %c0_i32_1 = arith.constant 0 : i32
    return %c0_i32, %c0_i32_0 : i32, i32
  }
  func.func @transform_8(%arg0: i32) -> (i32, i32) {
    %c0_i32 = arith.constant 0 : i32
    %c0_i32_0 = arith.constant 0 : i32
    %c0_i32_1 = arith.constant 0 : i32
    return %c0_i32, %c0_i32_0 : i32, i32
  }
  func.func @transform_9(%arg0: i32) -> (i32, i32) {
    %c0_i32 = arith.constant 0 : i32
    %c0_i32_0 = arith.constant 0 : i32
    return %arg0, %c0_i32 : i32, i32
  }
}

</mosaic_0001>

<bundles_post_ra>
// kernel: gaussian_policy_forward.1
= control target key start
LH: loop header
LB: loop body
LE: loop exit
PB: predicated region body
PF: predicated region fallthrough
CT: control target
= control target key end

     0   :  { %v420_v0 = vmov 0.0|0.0   ;;  %vm421_vm0 = vmmov 0   ;;  %v422_v3 = vmov 0.0   ;;  %vm42_vm1 = vcmask 130048   ;;  %s551_s1 = inlined_call_operand.vmem [shape: f32[16,64], index: 1, kind: input, shape index: {}]   ;;  %s552_s3 = inlined_call_operand.vmem [shape: f32[64,64], index: 3, kind: input, shape index: {}]   ;;  %s553_s0 = inlined_call_operand.vmem [shape: f32[8,16], index: 0, kind: input, shape index: {}]   ;;  %s554_s5 = inlined_call_operand.vmem [shape: f32[64,128], index: 5, kind: input, shape index: {}]   ;;  %s555_s2 = inlined_call_operand.vmem [shape: f32[1,64], index: 2, kind: input, shape index: {}]   ;;  %s556_s4 = inlined_call_operand.vmem [shape: f32[1,64], index: 4, kind: input, shape index: {}]   ;;  %s557_s6 = inlined_call_operand.vmem [shape: f32[1,128], index: 6, kind: input, shape index: {}]   ;;  %s558_s7 = inlined_call_operand.vmem [shape: f32[1,128], index: 7, kind: input, shape index: {}]   ;;  %s559_s8 = inlined_call_operand.vmem [shape: f32[1,128], index: 8, kind: input, shape index: {}]   ;;  %s560_s9 = inlined_call_operand.vmem [shape: f32[8,128], index: 9, kind: output, shape index: {}]  }
   0x1   :  { %390 = vmatprep.subr.bf16.mxu0 %v420_v0  ;;  %v33_v1 = vld [vmem:[%s551_s1] sm:$0xff]  ;;  %v34_v2 = vld [vmem:[%s551_s1 + $0x8] sm:$0xff]  ;;  %349 = vmatprep.mubr.msk.f32.mxu0 %vm421_vm0, %v422_v3  ;;  %v119_v7 = vld [vmem:[%s552_s3 + $0x10] sm:$0xff]  ;;  %vm132_vm2 = vcmask 523264  }
   0x2   :  { %v391_v4 = vpack.c.bf16 %v34_v2, %v33_v1  ;;  %393 = vmatprep.subr.bf16.mxu1 %v420_v0  ;;  %v117_v5 = vld [vmem:[%s552_s3] sm:$0xff]  ;;  %v118_v6 = vld [vmem:[%s552_s3 + $0x8] sm:$0xff]  ;;  %368 = vmatprep.mubr.msk.f32.mxu1 %vm421_vm0, %v422_v3  ;;  %v120_v9 = vld [vmem:[%s552_s3 + $0x18] sm:$0xff] }
   0x3   :  { %v394_v8 = vpack.c.bf16 %v118_v6, %v117_v5  ;;  %v32_v10 = vld [vmem:[%s553_s0] sm:$0xff]  ;;  %v397_v11 = vpack.c.bf16 %v120_v9, %v119_v7  ;;  %v122_v13 = vld [vmem:[%s552_s3 + $0x28] sm:$0xff]  ;;  %v123_v15 = vld [vmem:[%s552_s3 + $0x30] sm:$0xff] }
   0x4   :  { %392 = vmatpush3.bf16.msra.mxu0 %v391_v4  ;;  %v121_v12 = vld [vmem:[%s552_s3 + $0x20] sm:$0xff]  ;;  %v124_v16 = vld [vmem:[%s552_s3 + $0x38] sm:$0xff]  ;;  %v208_v19 = vld [vmem:[%s554_s5 + $0x8] sm:$0xff] }
   0x5   :  { %395 = vmatpush3.bf16.msra.mxu1 %v394_v8  ;;  %405 = vmatprep.subr.bf16.mxu0 %v420_v0  ;;  %v400_v14 = vpack.c.bf16 %v122_v13, %v121_v12  ;;  %v403_v17 = vpack.c.bf16 %v124_v16, %v123_v15  ;;  %v207_v18 = vld [vmem:[%s554_s5] sm:$0xff]  ;;  %v209_v20 = vld [vmem:[%s554_s5 + $0x10] sm:$0xff]  ;;  %v210_v22 = vld [vmem:[%s554_s5 + $0x18] sm:$0xff] }
   0x6   :  { %396 = vmatprep.subr.bf16.mxu1 %v420_v0  ;;  %v406_v21 = vpack.c.bf16 %v208_v19, %v207_v18  ;;  %v409_v23 = vpack.c.bf16 %v210_v22, %v209_v20  ;;  %v211_v24 = vld [vmem:[%s554_s5 + $0x20] sm:$0xff]  ;;  %v212_v25 = vld [vmem:[%s554_s5 + $0x28] sm:$0xff]  ;;  %v213_v32 = vld [vmem:[%s554_s5 + $0x30] sm:$0xff] }
   0x7   :  { %350 = vmatmul.mubr.msk.f32.vlgmr.msra.gmra.mrb[0].mxu0 %vm42_vm1, %v32_v10  ;;  %v412_v26 = vpack.c.bf16 %v212_v25, %v211_v24  ;;  %v316_v27 = vld [vmem:[%s555_s2] ss:$0 sm:$0xff]  ;;  %v214_v33 = vld [vmem:[%s554_s5 + $0x38] sm:$0xff] }
   0x8   :  { %387 = vmatprep.mubr.msk.f32.mxu0 %vm421_vm0, %v422_v3  ;;  %407 = vmatpush3.bf16.msra.mxu0 %v406_v21  ;;  %v415_v34 = vpack.c.bf16 %v214_v33, %v213_v32  ;;  %v318_v35 = vld [vmem:[%s556_s4] ss:$0 sm:$0xff] }
   0x9   :  { %398 = vmatpush3.bf16.msra.mxu1 %v397_v11  ;;  %408 = vmatprep.subr.bf16.mxu0 %v420_v0  ;;  %v320_v40 = vld [vmem:[%s557_s6] ss:$0 sm:$0xff] }
   0xa   :  { %399 = vmatprep.subr.bf16.mxu1 %v420_v0  ;;  %v322_v42 = vld [vmem:[%s558_s7] ss:$0 sm:$0xff] }
   0xb   :  { %v323_v45 = vld [vmem:[%s559_s8] ss:$0 sm:$0xff] }
   0xc   :  { %410 = vmatpush3.bf16.msra.mxu0 %v409_v23 }
   0xd   :  { %401 = vmatpush3.bf16.msra.mxu1 %v400_v14  ;;  %411 = vmatprep.subr.bf16.mxu0 %v420_v0 }
   0xe   :  { %402 = vmatprep.subr.bf16.mxu1 %v420_v0 }
  0x10   :  { %413 = vmatpush3.bf16.msra.mxu0 %v412_v26 }
  0x11   :  { %404 = vmatpush3.bf16.msra.mxu1 %v403_v17  ;;  %414 = vmatprep.subr.bf16.mxu0 %v420_v0 }
  0x14   :  { %416 = vmatpush3.bf16.msra.mxu0 %v415_v34 }
  0xda   :  { %v112_v28 = vpop.f32.mrb[0].mxu0 }
  0xdb   :  { %v113_v29 = vadd.f32 %v316_v27, %v112_v28  ;;  %v351_v30 = vpop.f32.mrb[1].mxu0 }
  0xdd   :  { %v116_v31 = vmax.f32 %v113_v29, 0.0 }
  0xdf   :  { %369 = vmatmul.mubr.msk.f32.vlgmr.msra.gmra.mrb[0].mxu1 %vm132_vm2, %v116_v31 }
 0x1b2   :  { %v202_v36 = vpop.f32.mrb[0].mxu1 }
 0x1b3   :  { %v203_v37 = vadd.f32 %v318_v35, %v202_v36  ;;  %v370_v38 = vpop.f32.mrb[1].mxu1 }
 0x1b5   :  { %v206_v39 = vmax.f32 %v203_v37, 0.0 }
 0x1b7   :  { %388 = vmatmul.mubr.msk.f32.vlgmr.msra.gmra.mrb[2].mxu0 %vm132_vm2, %v206_v39 }
 0x28a   :  { %v291_v41 = vpop.f32.mrb[2].mxu0 }
 0x28b   :  { %v292_v43 = vadd.f32 %v320_v40, %v291_v41  ;;  %v389_v44 = vpop.f32.mrb[3].mxu0 }
 0x28d   :  { %v302_v46 = vmax.f32 %v292_v43, %v322_v42 }
 0x28f   :  { %v310_v47 = vmin.f32 %v302_v46, %v323_v45 }
 0x291   :  { %311 = vst [vmem:[%s560_s9] sm:$0xff] %v310_v47 }

</bundles_post_ra>
